<compile_context>
chip_gen: v7x
topology: tpu7x:2x2x1
jax: 0.10.0
libtpu: 0.0.40
codegen_flags: <defaults>
</compile_context>

<pallas_src>
import math
from functools import partial

import jax
import jax.numpy as jnp
from jax import lax
from jax.experimental import pallas as pl
from jax.experimental.pallas import tpu as pltpu


# ----------------------------- Pallas kernel ------------------------------ #
def _diffusion_loss_kernel(aux_ref,                    # (1, bbf, 2*rC + rHd) f32
                           x0_ref, nz_ref,             # (bbf, rC, HW) f32
                           w1p_ref, w2p_ref, b2p_ref,  # (rHd, rC), (rC, rHd), (rC, 1) f32
                           out_ref):                   # (1, 1, HW) f32 partial sums
    bbf, rc, hw = x0_ref.shape
    rhd = w1p_ref.shape[0]

    # packed small operands: [a rows | s rows | (temb + b1) rows]
    aux = aux_ref[0]                                   # (bbf, 2*rc + rhd)
    a = aux[:, 0:rc][:, :, None]                       # (bbf, rc, 1)
    s = aux[:, rc:2 * rc][:, :, None]                  # (bbf, rc, 1)
    temb = aux[:, 2 * rc:2 * rc + rhd][:, :, None]     # (bbf, rhd, 1)

    x0 = x0_ref[...]
    nz = nz_ref[...]

    # q_sample: x_t = sqrt(alphas_cumprod[t]) * x0 + sqrt(1 - alphas_cumprod[t]) * noise
    x_t = a * x0 + s * nz                              # (bbf, rc, hw)

    # synthetic denoiser (two 1x1 convs), folded channel rows in sublanes, pixels in lanes.
    w1b = jnp.broadcast_to(w1p_ref[...][None], (bbf, rhd, rc))
    h = lax.dot_general(w1b, x_t, (((2,), (1,)), ((0,), (0,))),
                        preferred_element_type=jnp.float32)       # (bbf, rhd, hw)
    h = jnp.maximum(h + temb, 0.0)                                # temb already holds b1

    w2b = jnp.broadcast_to(w2p_ref[...][None], (bbf, rc, rhd))
    pred = lax.dot_general(w2b, h, (((2,), (1,)), ((0,), (0,))),
                           preferred_element_type=jnp.float32)    # (bbf, rc, hw)
    pred = pred + b2p_ref[...][None]                              # (1, rc, 1) broadcast

    # squared-error partial sums: reduce fold + row axes, keep the lane axis dense.
    d = pred - nz
    part = jnp.sum(jnp.sum(d * d, axis=1), axis=0)                # (hw,)
    out_ref[...] = part.reshape(1, 1, hw)


# ------------------------------- wrapper ----------------------------------- #
@partial(jax.jit, static_argnames=("block_images",))
def gaussian_diffusion_loss(x0_nchw, noise_nchw, t, sqrt_ac, sqrt_1mac,
                            temb, w1, b1, w2, b2, *, block_images=64):
    B, C, H, W = x0_nchw.shape
    HW = H * W
    Hd = w1.shape[1]

    # Fold r images together so the folded channel dim (r*C) is a multiple of 8
    # -> trailing (rC, HW) tiles are dense, no sublane padding on the big DMAs.
    r = 8 // math.gcd(C, 8)
    if B % r != 0:
        # TODO(synk): pad the batch instead; r=1 re-introduces 2x sublane padding on DMA.
        r = 1
    Bf = B // r
    rC, rHd = r * C, r * Hd

    # Folds per grid step (keep G >= 2 when possible so "parallel" uses both TensorCores).
    max_folds = max(1, block_images // r)
    if Bf >= 2:
        max_folds = max(1, min(max_folds, Bf // 2))
    bbf = 1
    for d in range(1, min(max_folds, Bf) + 1):   # TODO(synk): masked last block for prime Bf
        if Bf % d == 0:
            bbf = d
    G = Bf // bbf

    # Big streams: free reshape of NCHW, fed as f32 directly (no extra cast/transpose pass).
    x0 = x0_nchw.reshape(Bf, rC, HW).astype(jnp.float32)
    nz = noise_nchw.reshape(Bf, rC, HW).astype(jnp.float32)

    # Packed lane-dense per-fold small operand: [a rows | s rows | temb + b1 rows].
    a_rows = jnp.repeat(sqrt_ac[t].astype(jnp.float32), C).reshape(Bf, rC)
    s_rows = jnp.repeat(sqrt_1mac[t].astype(jnp.float32), C).reshape(Bf, rC)
    temb_rows = (temb + b1).astype(jnp.float32).reshape(Bf, rHd)
    aux = jnp.concatenate([a_rows, s_rows, temb_rows], axis=1)    # (Bf, 2*rC + rHd)
    A = 2 * rC + rHd
    aux = aux.reshape(G, bbf, A)   # pre-split so the block takes the full trailing dims

    # Fold the 1x1-conv weights into block-diagonal matrices (constant across grid steps).
    eye_r = jnp.eye(r, dtype=jnp.float32)
    w1p = jnp.kron(eye_r, jnp.asarray(w1, jnp.float32).T)         # (rHd, rC)
    w2p = jnp.kron(eye_r, jnp.asarray(w2, jnp.float32).T)         # (rC, rHd)
    b2p = jnp.tile(jnp.asarray(b2, jnp.float32).reshape(C, 1), (r, 1))   # (rC, 1)

    partial_sums = pl.pallas_call(
        _diffusion_loss_kernel,
        out_shape=jax.ShapeDtypeStruct((G, 1, HW), jnp.float32),
        grid=(G,),
        in_specs=[
            pl.BlockSpec((1, bbf, A), lambda g: (g, 0, 0)),       # packed aux
            pl.BlockSpec((bbf, rC, HW), lambda g: (g, 0, 0)),     # x0   (f32, dense tiles)
            pl.BlockSpec((bbf, rC, HW), lambda g: (g, 0, 0)),     # noise (f32, dense tiles)
            pl.BlockSpec((rHd, rC), lambda g: (0, 0)),            # blockdiag(w1^T)
            pl.BlockSpec((rC, rHd), lambda g: (0, 0)),            # blockdiag(w2^T)
            pl.BlockSpec((rC, 1), lambda g: (0, 0)),              # tiled b2
        ],
        out_specs=pl.BlockSpec((1, 1, HW), lambda g: (g, 0, 0)),
        compiler_params=pltpu.CompilerParams(
            dimension_semantics=("parallel",)),                   # no resident accumulator
    )(aux, x0, nz, w1p, w2p, b2p)

    # mse_loss = mean over all elements (final tiny reduction in JAX)
    return jnp.sum(partial_sums) / jnp.float32(B * C * H * W)


# --------------------------- schedule / params ----------------------------- #
def make_linear_schedule(timesteps):
    betas = jnp.linspace(1e-4, 0.02, timesteps, dtype=jnp.float32)
    alphas = 1.0 - betas
    alphas_cumprod = jnp.cumprod(alphas)
    return jnp.sqrt(alphas_cumprod), jnp.sqrt(1.0 - alphas_cumprod)


def sinusoidal_time_embedding(t, dim):
    half = dim // 2
    freqs = jnp.exp(-math.log(10000.0) * jnp.arange(half, dtype=jnp.float32) / half)
    args = t.astype(jnp.float32)[:, None] * freqs[None, :]
    return jnp.concatenate([jnp.sin(args), jnp.cos(args)], axis=-1)   # (B, dim)


def _reference_loss(x0_nchw, noise_nchw, t, sqrt_ac, sqrt_1mac, temb, w1, b1, w2, b2):
    """Pure-JAX f32 reference of the same forward pass."""
    B, C, H, W = x0_nchw.shape
    x0 = x0_nchw.reshape(B, C, H * W).astype(jnp.float32)
    nz = noise_nchw.reshape(B, C, H * W).astype(jnp.float32)
    a = sqrt_ac[t].reshape(B, 1, 1)
    s = sqrt_1mac[t].reshape(B, 1, 1)
    x_t = a * x0 + s * nz
    h = jnp.einsum('hc,bcn->bhn', w1.T, x_t) + (temb + b1).reshape(B, -1, 1)
    h = jnp.maximum(h, 0.0)
    pred = jnp.einsum('ch,bhn->bcn', w2.T, h) + b2.reshape(1, C, 1)
    return jnp.mean((pred - nz) ** 2)


if __name__ == "__main__":
    # small, forward-consistent shapes
    B, C, IMG, HIDDEN, TIMESTEPS = 2, 4, 16, 32, 100

    key = jax.random.PRNGKey(0)
    k_x, k_t, k_noise, k_w1, k_b1, k_w2, k_b2 = jax.random.split(key, 7)

    # clean images (NCHW, like the PyTorch module expects)
    x_0 = jax.random.normal(k_x, (B, C, IMG, IMG), dtype=jnp.float32)

    # forward(): t ~ randint, noise ~ randn_like
    # TODO(synk): torch RNG inside forward() is reproduced with jax.random in host glue.
    t = jax.random.randint(k_t, (B,), 0, TIMESTEPS, dtype=jnp.int32)
    noise = jax.random.normal(k_noise, (B, C, IMG, IMG), dtype=jnp.float32)

    # diffusion buffers (linear beta schedule, as in __init__)
    sqrt_ac, sqrt_1mac = make_linear_schedule(TIMESTEPS)

    # deterministic synthetic denoiser parameters (two 1x1 convs)
    w1 = 0.1 * jax.random.normal(k_w1, (C, HIDDEN), dtype=jnp.float32)
    b1 = 0.01 * jax.random.normal(k_b1, (1, HIDDEN), dtype=jnp.float32)
    w2 = 0.1 * jax.random.normal(k_w2, (HIDDEN, C), dtype=jnp.float32)
    b2 = 0.01 * jax.random.normal(k_b2, (1, C), dtype=jnp.float32)

    temb = sinusoidal_time_embedding(t, HIDDEN)   # (B, HIDDEN)

    loss = gaussian_diffusion_loss(x_0, noise, t, sqrt_ac, sqrt_1mac,
                                   temb, w1, b1, w2, b2)
    loss = jax.block_until_ready(loss)

    ref = jax.block_until_ready(
        _reference_loss(x_0, noise, t, sqrt_ac, sqrt_1mac, temb, w1, b1, w2, b2))

    assert loss.shape == () and bool(jnp.isfinite(loss))
    assert abs(float(loss) - float(ref)) <= 2e-2 * abs(float(ref)) + 1e-6, (float(loss), float(ref))
    print("KERNEL_OK")
</pallas_src>

<mosaic_0001>
module attributes {stable_mosaic.version = 11 : i64} {
  func.func @_diffusion_loss_kernel(%arg0: i32, %arg1: memref<1x1x80xf32, #tpu.memory_space<vmem>>, %arg2: memref<1x8x256xf32, #tpu.memory_space<vmem>>, %arg3: memref<1x8x256xf32, #tpu.memory_space<vmem>>, %arg4: memref<64x8xf32, #tpu.memory_space<vmem>>, %arg5: memref<8x64xf32, #tpu.memory_space<vmem>>, %arg6: memref<8x1xf32, #tpu.memory_space<vmem>>, %arg7: memref<1x1x256xf32, #tpu.memory_space<vmem>>) attributes {dimension_semantics = [#tpu.dimension_semantics<parallel>], iteration_bounds = array<i64: 1>, scalar_prefetch = 0 : i64, scratch_operands = 0 : i64, tpu.core_type = #tpu.core_type<tc>, window_params = [{transform_indices = @transform_0, window_bounds = array<i64: 1, 1, 80>}, {transform_indices = @transform_1, window_bounds = array<i64: 1, 8, 256>}, {transform_indices = @transform_2, window_bounds = array<i64: 1, 8, 256>}, {pipeline_mode = #tpu.pipeline_mode<synchronous>, transform_indices = @transform_3, window_bounds = array<i64: 64, 8>}, {pipeline_mode = #tpu.pipeline_mode<synchronous>, transform_indices = @transform_4, window_bounds = array<i64: 8, 64>}, {pipeline_mode = #tpu.pipeline_mode<synchronous>, transform_indices = @transform_5, window_bounds = array<i64: 8, 1>}, {transform_indices = @transform_6, window_bounds = array<i64: 1, 1, 256>}]} {
    %c0 = arith.constant 0 : index
    %c0_0 = arith.constant 0 : index
    %c0_1 = arith.constant 0 : index
    %0 = vector.load %arg1[%c0, %c0_0, %c0_1] : memref<1x1x80xf32, #tpu.memory_space<vmem>>, vector<1x1x80xf32>
    %1 = vector.shape_cast %0 : vector<1x1x80xf32> to vector<1x80xf32>
    %2 = vector.extract_strided_slice %1 {offsets = [0, 0], sizes = [1, 8], strides = [1, 1]} : vector<1x80xf32> to vector<1x8xf32>
    %3 = vector.shape_cast %2 : vector<1x8xf32> to vector<1x8x1xf32>
    %4 = vector.extract_strided_slice %1 {offsets = [0, 8], sizes = [1, 8], strides = [1, 1]} : vector<1x80xf32> to vector<1x8xf32>
    %5 = vector.shape_cast %4 : vector<1x8xf32> to vector<1x8x1xf32>
    %6 = vector.extract_strided_slice %1 {offsets = [0, 16], sizes = [1, 64], strides = [1, 1]} : vector<1x80xf32> to vector<1x64xf32>
    %7 = vector.shape_cast %6 : vector<1x64xf32> to vector<1x64x1xf32>
    %c0_2 = arith.constant 0 : index
    %c0_3 = arith.constant 0 : index
    %c0_4 = arith.constant 0 : index
    %8 = vector.load %arg2[%c0_2, %c0_3, %c0_4] : memref<1x8x256xf32, #tpu.memory_space<vmem>>, vector<1x8x256xf32>
    %c0_5 = arith.constant 0 : index
    %c0_6 = arith.constant 0 : index
    %c0_7 = arith.constant 0 : index
    %9 = vector.load %arg3[%c0_5, %c0_6, %c0_7] : memref<1x8x256xf32, #tpu.memory_space<vmem>>, vector<1x8x256xf32>
    %10 = vector.broadcast %3 : vector<1x8x1xf32> to vector<1x8x256xf32>
    %11 = arith.mulf %10, %8 : vector<1x8x256xf32>
    %12 = vector.broadcast %5 : vector<1x8x1xf32> to vector<1x8x256xf32>
    %13 = arith.mulf %12, %9 : vector<1x8x256xf32>
    %14 = arith.addf %11, %13 : vector<1x8x256xf32>
    %c0_8 = arith.constant 0 : index
    %c0_9 = arith.constant 0 : index
    %15 = vector.load %arg4[%c0_8, %c0_9] : memref<64x8xf32, #tpu.memory_space<vmem>>, vector<64x8xf32>
    %16 = vector.shape_cast %15 : vector<64x8xf32> to vector<1x64x8xf32>
    %cst = arith.constant dense<0.000000e+00> : vector<1x64x256xf32>
    %17 = tpu.matmul %16, %14, %cst {dimension_numbers = #tpu.dot_dimension_numbers<[2], [1], [1], [2], [0, 0, 0, 1, 1, 2], [0], [0]>} : vector<1x64x8xf32>, vector<1x8x256xf32>, vector<1x64x256xf32> -> vector<1x64x256xf32>
    %18 = vector.broadcast %7 : vector<1x64x1xf32> to vector<1x64x256xf32>
    %19 = arith.addf %17, %18 : vector<1x64x256xf32>
    %cst_10 = arith.constant 0.000000e+00 : f32
    %20 = vector.broadcast %cst_10 : f32 to vector<1x64x256xf32>
    %21 = arith.maximumf %19, %20 : vector<1x64x256xf32>
    %c0_11 = arith.constant 0 : index
    %c0_12 = arith.constant 0 : index
    %22 = vector.load %arg5[%c0_11, %c0_12] : memref<8x64xf32, #tpu.memory_space<vmem>>, vector<8x64xf32>
    %23 = vector.shape_cast %22 : vector<8x64xf32> to vector<1x8x64xf32>
    %cst_13 = arith.constant dense<0.000000e+00> : vector<1x8x256xf32>
    %24 = tpu.matmul %23, %21, %cst_13 {dimension_numbers = #tpu.dot_dimension_numbers<[2], [1], [1], [2], [0, 0, 0, 1, 1, 2], [0], [0]>} : vector<1x8x64xf32>, vector<1x64x256xf32>, vector<1x8x256xf32> -> vector<1x8x256xf32>
    %c0_14 = arith.constant 0 : index
    %c0_15 = arith.constant 0 : index
    %25 = vector.load %arg6[%c0_14, %c0_15] : memref<8x1xf32, #tpu.memory_space<vmem>>, vector<8x1xf32>
    %26 = vector.shape_cast %25 : vector<8x1xf32> to vector<1x8x1xf32>
    %27 = vector.broadcast %26 : vector<1x8x1xf32> to vector<1x8x256xf32>
    %28 = arith.addf %24, %27 : vector<1x8x256xf32>
    %29 = arith.subf %28, %9 : vector<1x8x256xf32>
    %30 = arith.mulf %29, %29 : vector<1x8x256xf32>
    %cst_16 = arith.constant dense<0.000000e+00> : vector<1x256xf32>
    %31 = vector.multi_reduction <add>, %30, %cst_16 [1] : vector<1x8x256xf32> to vector<1x256xf32>
    %cst_17 = arith.constant dense<0.000000e+00> : vector<256xf32>
    %32 = vector.multi_reduction <add>, %31, %cst_17 [0] : vector<1x256xf32> to vector<256xf32>
    %33 = vector.shape_cast %32 : vector<256xf32> to vector<1x1x256xf32>
    %c0_18 = arith.constant 0 : index
    %c0_19 = arith.constant 0 : index
    %c0_20 = arith.constant 0 : index
    %34 = vector.load %arg7[%c0_18, %c0_19, %c0_20] : memref<1x1x256xf32, #tpu.memory_space<vmem>>, vector<1x1x256xf32>
    tpu.vector_store %arg7[%c0_18, %c0_19, %c0_20], %33 {strides = array<i32>} : memref<1x1x256xf32, #tpu.memory_space<vmem>>, vector<1x1x256xf32>,
    return
  }
  func.func @transform_0(%arg0: i32) -> (i32, i32, i32) {
    %c0_i32 = arith.constant 0 : i32
    %c0_i32_0 = arith.constant 0 : i32
    %c0_i32_1 = arith.constant 0 : i32
    return %arg0, %c0_i32, %c0_i32_0 : i32, i32, i32
  }
  func.func @transform_1(%arg0: i32) -> (i32, i32, i32) {
    %c0_i32 = arith.constant 0 : i32
    %c0_i32_0 = arith.constant 0 : i32
    %c0_i32_1 = arith.constant 0 : i32
    return %arg0, %c0_i32, %c0_i32_0 : i32, i32, i32
  }
  func.func @transform_2(%arg0: i32) -> (i32, i32, i32) {
    %c0_i32 = arith.constant 0 : i32
    %c0_i32_0 = arith.constant 0 : i32
    %c0_i32_1 = arith.constant 0 : i32
    return %arg0, %c0_i32, %c0_i32_0 : i32, i32, i32
  }
  func.func @transform_3(%arg0: i32) -> (i32, i32) {
    %c0_i32 = arith.constant 0 : i32
    %c0_i32_0 = arith.constant 0 : i32
    %c0_i32_1 = arith.constant 0 : i32
    return %c0_i32, %c0_i32_0 : i32, i32
  }
  func.func @transform_4(%arg0: i32) -> (i32, i32) {
    %c0_i32 = arith.constant 0 : i32
    %c0_i32_0 = arith.constant 0 : i32
    %c0_i32_1 = arith.constant 0 : i32
    return %c0_i32, %c0_i32_0 : i32, i32
  }
  func.func @transform_5(%arg0: i32) -> (i32, i32) {
    %c0_i32 = arith.constant 0 : i32
    %c0_i32_0 = arith.constant 0 : i32
    %c0_i32_1 = arith.constant 0 : i32
    return %c0_i32, %c0_i32_0 : i32, i32
  }
  func.func @transform_6(%arg0: i32) -> (i32, i32, i32) {
    %c0_i32 = arith.constant 0 : i32
    %c0_i32_0 = arith.constant 0 : i32
    %c0_i32_1 = arith.constant 0 : i32
    return %arg0, %c0_i32, %c0_i32_0 : i32, i32, i32
  }
}

</mosaic_0001>

<bundles_post_ra>
// kernel: gaussian_diffusion_loss.1
= control target key start
LH: loop header
LB: loop body
LE: loop exit
PB: predicated region body
PF: predicated region fallthrough
CT: control target
= control target key end

     0   :  { %v396_v1 = vmov 0.0   ;;  %vm85_vm0 = vcmask 64512   ;;  %v397_v22 = vmov 0   ;;  %vm246_vm1 = vcmask 523264   ;;  %s498_s0 = inlined_call_operand.vmem [shape: f32[1,1,80], index: 0, kind: input, shape index: {}]   ;;  %s499_s1 = inlined_call_operand.vmem [shape: f32[1,8,256], index: 1, kind: input, shape index: {}]   ;;  %s500_s2 = inlined_call_operand.vmem [shape: f32[1,8,256], index: 2, kind: input, shape index: {}]   ;;  %s501_s3 = inlined_call_operand.vmem [shape: f32[64,8], index: 3, kind: input, shape index: {}]   ;;  %s502_s5 = inlined_call_operand.vmem [shape: f32[8,1], index: 5, kind: input, shape index: {}]   ;;  %s503_s4 = inlined_call_operand.vmem [shape: f32[8,64], index: 4, kind: input, shape index: {}]   ;;  %s504_s6 = inlined_call_operand.vmem [shape: f32[1,1,256], index: 6, kind: output, shape index: {}]  }
   0x1   :  { %v366_v0 = vld [vmem:[%s498_s0] ss:$0 sm:$0xff]  ;;  %174 = vmatprep.mubr.f32.mxu0 %v396_v1  ;;  %314 = vmatprep.mubr.f32.mxu1 %v396_v1  ;;  %v68_v4 = vld [vmem:[%s499_s1 + $0x8] sm:$0xff]  ;;  %v79_v16 = vld [vmem:[%s501_s3 + $0x10] sm:$0xff] }
   0x2   :  { %29 = vbcast.lane.b32.xlu0 %v366_v0, 256  ;;  %37 = vbcast.lane.b32.xlu1 %v366_v0, 272  ;;  %v67_v3 = vld [vmem:[%s499_s1] sm:$0xff]  ;;  %v451_v6 = vld [vmem:[%s500_s2 + $0x8] sm:$0xff]  ;;  %v80_v17 = vld [vmem:[%s501_s3 + $0x18] sm:$0xff] }
   0x3   :  { %v446_v5 = vld [vmem:[%s500_s2] sm:$0xff]  ;;  %v78_v15 = vld [vmem:[%s501_s3 + $0x8] sm:$0xff]  ;;  %v83_v20 = vld [vmem:[%s501_s3 + $0x30] sm:$0xff]  ;;  %395 = vset.pattern.permute.xlu0 %v397_v22 }
   0x4   :  { %v77_v14 = vld [vmem:[%s501_s3] sm:$0xff]  ;;  %v82_v19 = vld [vmem:[%s501_s3 + $0x28] sm:$0xff]  ;;  %v84_v21 = vld [vmem:[%s501_s3 + $0x38] sm:$0xff] }
   0x5   :  { %v81_v18 = vld [vmem:[%s501_s3 + $0x20] sm:$0xff] }
   0x6   :  { %33 = vbcast.lane.b32.xlu0 %v366_v0, 264  ;;  %41 = vbcast.lane.b32.xlu1 %v366_v0, 280  ;;  %v240_v23 = vld [vmem:[%s502_s5] sm:$0xff] }
   0xa   :  { %45 = vbcast.lane.b32.xlu0 %v366_v0, 288  ;;  %49 = vbcast.lane.b32.xlu1 %v366_v0, 296 }
   0xe   :  { %53 = vbcast.lane.b32.xlu0 %v366_v0, 304  ;;  %57 = vbcast.lane.b32.xlu1 %v366_v0, 312 }
  0x12   :  { %61 = vbcast.lane.b32.xlu0 %v366_v0, 320  ;;  %65 = vbcast.lane.b32.xlu1 %v366_v0, 328 }
  0x16   :  { %243 = vperm.xlu0 %395, %v240_v23  }
  0x74   :  { %v30_v2 = vpop.permute.xlu0 %29  ;;  %v38_v24 = vpop.permute.xlu1 %37 }
  0x75   :  { %v71_v8 = vmul.f32 %v67_v3, %v30_v2  ;;  %v72_v9 = vmul.f32 %v68_v4, %v30_v2 }
  0x78   :  { %v34_v7 = vpop.permute.xlu0 %33  ;;  %v42_v27 = vpop.permute.xlu1 %41 }
  0x79   :  { %v73_v10 = vmul.f32 %v446_v5, %v34_v7  ;;  %v74_v11 = vmul.f32 %v451_v6, %v34_v7 }
  0x7b   :  { %v76_v12 = vadd.f32 %v74_v11, %v72_v9  ;;  %v75_v13 = vadd.f32 %v73_v10, %v71_v8 }
  0x7c   :  { %v46_v39 = vpop.permute.xlu0 %45  ;;  %v50_v42 = vpop.permute.xlu1 %49 }
  0x7d   :  { %110 = vmatprep.subr.mxu0 %v76_v12 }
  0x7e   :  { %111 = vmatpush1.msra.mxu0 %v75_v13 }
  0x7f   :  { %367 = vmatmul.mubr.msk.f32.vlgmr.msra.gmra.mrb[0].mxu0 %vm85_vm0, %v77_v14 }
  0x80   :  { %180 = vmatprep.mubr.f32.mxu0 %v396_v1  ;;  %v54_v55 = vpop.permute.xlu0 %53  ;;  %v58_v59 = vpop.permute.xlu1 %57 }
  0x83   :  { %368 = vmatmul.mubr.msk.f32.gmra.mrb[2].mxu0 %vm85_vm0, %v78_v15 }
  0x84   :  { %186 = vmatprep.mubr.f32.mxu0 %v396_v1  ;;  %v62_v9 = vpop.permute.xlu0 %61  ;;  %v66_v13 = vpop.permute.xlu1 %65 }
  0x87   :  { %369 = vmatmul.mubr.msk.f32.gmra.mrb[4].mxu0 %vm85_vm0, %v79_v16 }
  0x88   :  { %192 = vmatprep.mubr.f32.mxu0 %v396_v1 }
  0x8b   :  { %370 = vmatmul.mubr.msk.f32.gmra.mrb[6].mxu0 %vm85_vm0, %v80_v17 }
  0x8c   :  { %198 = vmatprep.mubr.f32.mxu0 %v396_v1 }
  0x8f   :  { %371 = vmatmul.mubr.msk.f32.gmra.mrb[8].mxu0 %vm85_vm0, %v81_v18 }
  0x90   :  { %204 = vmatprep.mubr.f32.mxu0 %v396_v1 }
  0x93   :  { %372 = vmatmul.mubr.msk.f32.gmra.mrb[10].mxu0 %vm85_vm0, %v82_v19 }
  0x94   :  { %210 = vmatprep.mubr.f32.mxu0 %v396_v1 }
  0x97   :  { %373 = vmatmul.mubr.msk.f32.gmra.mrb[12].mxu0 %vm85_vm0, %v83_v20 }
  0x98   :  { %216 = vmatprep.mubr.f32.mxu0 %v396_v1 }
  0x9b   :  { %374 = vmatmul.mubr.msk.f32.gmra.mrb[14].mxu0 %vm85_vm0, %v84_v21 }
 0x152   :  { %v176_v25 = vpop.f32.mrb[0].mxu0 }
 0x153   :  { %v178_v26 = vpop.f32.mrb[1].mxu0  ;;  %v177_v28 = vadd.f32 %v176_v25, %v38_v24 }
 0x154   :  { %v179_v29 = vadd.f32 %v178_v26, %v38_v24  ;;  %v239_v26 = vld [vmem:[%s503_s4] sm:$0xff] }
 0x155   :  { %v223_v34 = vmax.f32 %v177_v28, 0.0 }
 0x156   :  { %v182_v30 = vpop.f32.mrb[2].mxu0  ;;  %v224_v36 = vmax.f32 %v179_v29, 0.0 }
 0x157   :  { %v183_v31 = vadd.f32 %v182_v30, %v42_v27  ;;  %v184_v32 = vpop.f32.mrb[3].mxu0 }
 0x158   :  { %v185_v33 = vadd.f32 %v184_v32, %v42_v27  ;;  %v244_v27 = vpop.permute.xlu0 %243 }
 0x159   :  { %v225_v35 = vmax.f32 %v183_v31, 0.0 }
 0x15a   :  { %v226_v37 = vmax.f32 %v185_v33, 0.0  ;;  %v188_v38 = vpop.f32.mrb[4].mxu0 }
 0x15b   :  { %v190_v40 = vpop.f32.mrb[5].mxu0  ;;  %v378_v41 = vpack.c.bf16 %v225_v35, %v223_v34  ;;  %v189_v44 = vadd.f32 %v188_v38, %v46_v39 }
 0x15c   :  { %v376_v43 = vpack.c.bf16 %v226_v37, %v224_v36  ;;  %v191_v45 = vadd.f32 %v190_v40, %v46_v39  ;;  %v398_v40 = vmov 1966171168  }
 0x15d   :  { %v227_v50 = vmax.f32 %v189_v44, 0.0 }
 0x15e   :  { %v194_v46 = vpop.f32.mrb[6].mxu0  ;;  %377 = vmatprep.subr.bf16.mxu1 %v376_v43  ;;  %v228_v52 = vmax.f32 %v191_v45, 0.0 }
 0x15f   :  { %v195_v47 = vadd.f32 %v194_v46, %v50_v42  ;;  %v196_v48 = vpop.f32.mrb[7].mxu0  ;;  %379 = vmatpush1.bf16.msra.mxu1 %v378_v41  ;;  %v343_v41 = vunpack.c.l.s4 %v398_v40 }
 0x160   :  { %v197_v49 = vadd.f32 %v196_v48, %v50_v42  ;;  %v345_v42 = vlaneseq }
 0x161   :  { %v229_v51 = vmax.f32 %v195_v47, 0.0  ;;  %v344_v47 = vunpack.c.0.s8 %v343_v41 }
 0x162   :  { %v230_v53 = vmax.f32 %v197_v49, 0.0  ;;  %v200_v54 = vpop.f32.mrb[8].mxu0  ;;  %v346_v48 = vshrl.u32 %v345_v42, 7  ;;  %vm359_vm2 = vcmp.lt.s32.totalorder %v345_v42, 256 }
 0x163   :  { %v382_v56 = vpack.c.bf16 %v229_v51, %v227_v50  ;;  %v202_v57 = vpop.f32.mrb[9].mxu0  ;;  %v201_v60 = vadd.f32 %v200_v54, %v54_v55 }
 0x164   :  { %v380_v58 = vpack.c.bf16 %v230_v53, %v228_v52  ;;  %v203_v61 = vadd.f32 %v202_v57, %v54_v55 }
 0x165   :  { %v231_v2 = vmax.f32 %v201_v60, 0.0 }
 0x166   :  { %v206_v62 = vpop.f32.mrb[10].mxu0  ;;  %381 = vmatprep.subr.bf16.mxu1 %v380_v58  ;;  %v232_v4 = vmax.f32 %v203_v61, 0.0 }
 0x167   :  { %v207_v63 = vadd.f32 %v206_v62, %v58_v59  ;;  %v208_v0 = vpop.f32.mrb[11].mxu0  ;;  %383 = vmatpush1.bf16.msra.mxu1 %v382_v56 }
 0x168   :  { %v209_v1 = vadd.f32 %v208_v0, %v58_v59 }
 0x169   :  { %v233_v3 = vmax.f32 %v207_v63, 0.0 }
 0x16a   :  { %v234_v7 = vmax.f32 %v209_v1, 0.0  ;;  %v212_v8 = vpop.f32.mrb[12].mxu0 }
 0x16b   :  { %v386_v10 = vpack.c.bf16 %v233_v3, %v231_v2  ;;  %v214_v11 = vpop.f32.mrb[13].mxu0  ;;  %v213_v14 = vadd.f32 %v212_v8, %v62_v9 }
 0x16c   :  { %v384_v12 = vpack.c.bf16 %v234_v7, %v232_v4  ;;  %v215_v15 = vadd.f32 %v214_v11, %v62_v9 }
 0x16d   :  { %v235_v20 = vmax.f32 %v213_v14, 0.0 }
 0x16e   :  { %v218_v16 = vpop.f32.mrb[14].mxu0  ;;  %385 = vmatprep.subr.bf16.mxu1 %v384_v12  ;;  %v236_v22 = vmax.f32 %v215_v15, 0.0 }
 0x16f   :  { %v219_v17 = vadd.f32 %v218_v16, %v66_v13  ;;  %v220_v18 = vpop.f32.mrb[15].mxu0  ;;  %387 = vmatpush1.bf16.msra.mxu1 %v386_v10 }
 0x170   :  { %v221_v19 = vadd.f32 %v220_v18, %v66_v13 }
 0x171   :  { %v237_v21 = vmax.f32 %v219_v17, 0.0 }
 0x172   :  { %v238_v23 = vmax.f32 %v221_v19, 0.0 }
 0x173   :  { %v390_v24 = vpack.c.bf16 %v237_v21, %v235_v20 }
 0x174   :  { %v388_v25 = vpack.c.bf16 %v238_v23, %v236_v22 }
 0x176   :  { %389 = vmatprep.subr.bf16.mxu1 %v388_v25 }
 0x177   :  { %391 = vmatpush1.bf16.msra.mxu1 %v390_v24 }
 0x17a   :  { %375 = vmatmul.mubr.msk.f32.vlgmr.msra.gmra.mrb[0].mxu1 %vm246_vm1, %v239_v26 }
 0x24d   :  { %v316_v28 = vpop.f32.mrb[0].mxu1 }
 0x24e   :  { %v317_v29 = vadd.f32 %v316_v28, %v244_v27  ;;  %v318_v30 = vpop.f32.mrb[1].mxu1 }
 0x24f   :  { %v319_v31 = vadd.f32 %v318_v30, %v244_v27 }
 0x250   :  { %v321_v32 = vsub.f32 %v317_v29, %v446_v5 }
 0x251   :  { %v322_v33 = vsub.f32 %v319_v31, %v451_v6  ;;  %v347_v6 = vsub.s32 %v344_v47, %v346_v48 }
 0x252   :  { %v323_v34 = vmul.f32 %v321_v32, %v321_v32 }
 0x253   :  { %v324_v35 = vmul.f32 %v322_v33, %v322_v33 }
 0x254   :  { %v325_v36 = vrot.slane %v323_v34, 4 }
 0x255   :  { %v331_v37 = vrot.slane %v324_v35, 4 }
 0x256   :  { %v326_v38 = vadd.f32 %v325_v36, %v323_v34 }
 0x257   :  { %v332_v39 = vadd.f32 %v331_v37, %v324_v35 }
 0x258   :  { %v327_v43 = vrot.slane %v326_v38, 2 }
 0x259   :  { %v333_v44 = vrot.slane %v332_v39, 2 }
 0x25a   :  { %v328_v45 = vadd.f32 %v327_v43, %v326_v38 }
 0x25b   :  { %v334_v46 = vadd.f32 %v333_v44, %v332_v39 }
 0x25c   :  { %v329_v49 = vrot.slane %v328_v45, 1 }
 0x25d   :  { %v335_v50 = vrot.slane %v334_v46, 1 }
 0x25e   :  { %v330_v5 = vadd.f32 %v329_v49, %v328_v45 }
 0x25f   :  { %v336_v51 = vadd.f32 %v335_v50, %v334_v46 }
 0x261   :  { %v341_v52 = vcombine.low %v330_v5, %v336_v51 }
 0x263   :  { %v348_v53 = vrot.slane %v341_v52, %v347_v6 }
 0x265   :  { %v355_v54 = vrot.slane %v348_v53, %v347_v6 }
 0x267   :  { %361 = vst.msk [vmem:[%s504_s6] sm:$0x3] %vm359_vm2, %v355_v54 }

</bundles_post_ra>
